<compile_context>
chip_gen: v7x
topology: tpu7x:2x2x1
jax: 0.10.0
libtpu: 0.0.40
codegen_flags: <defaults>
</compile_context>

<pallas_src>
import jax
import jax.numpy as jnp
from jax import lax
from jax.experimental import pallas as pl
from jax.experimental.pallas import tpu as pltpu


def _linear_kernel(x_ref, w_ref, b_ref, o_ref):
    """One batch tile of  y = x @ W^T + b.

    x_ref: (TB, D) VMEM tile  (batch rows on sublanes, features on lanes)
    w_ref: (1, D)  VMEM       (resident; constant index map)
    b_ref: (1,)    SMEM       (scalar bias)
    o_ref: (1, TB) VMEM       (lane-dense output tile, batch on lanes)
    """
    # w (1, D) . x (TB, D) contracting the last dims -> (1, TB) f32.
    # Same dimension-number pattern as q @ k.T in flash attention, which the
    # MXU supports natively (transposing weight-load path) -- no full-tile
    # vxpose of x. Result is already lane-dense, so the store is a full-lane
    # vst with no XLU lane-reduce.
    acc = lax.dot_general(
        w_ref[...], x_ref[...],
        dimension_numbers=(((1,), (1,)), ((), ())),
        preferred_element_type=jnp.float32,
    )                                            # (1, TB) f32
    o_ref[...] = (acc + b_ref[0]).astype(o_ref.dtype)


def _round_up(v, m):
    return (v + m - 1) // m * m


def _vmem_capacity_bytes():
    """Per-core VMEM capacity; conservative (v7x-sized) fallback."""
    try:
        return int(pltpu.get_tpu_info().vmem_capacity_bytes)
    except Exception:
        return 64 << 20


def _choose_batch_tile(batch, feat_dim, itemsize, per_buffer_bytes):
    """Pick a lane-aligned (multiple of 128) batch tile, sized by VMEM bytes."""
    d_pad = _round_up(feat_dim, 128)          # true lane footprint of one row
    bytes_per_row = d_pad * itemsize
    # Largest 128-aligned tile whose single pipeline buffer fits the target.
    tb_cap = max(128, (per_buffer_bytes // bytes_per_row) // 128 * 128)
    b128 = _round_up(batch, 128)
    tb = min(tb_cap, b128)

    # Prefer an even grid of >= 4 steps when the batch allows: the
    # ("parallel",) batch axis then splits evenly across v7x's 2 TensorCores
    # and each core still has >= 2 steps to pipeline. Harmless on 1-TC chips.
    steps = pl.cdiv(batch, tb)
    tiles_avail = b128 // 128
    target = steps
    if tiles_avail >= 4:
        target = max(target, 4)
    if target % 2 == 1 and tiles_avail >= target + 1:
        target += 1
    if target != steps:
        tb = max(128, _round_up(pl.cdiv(batch, target), 128))
    return tb


def _vmem_need_bytes(tb, feat_dim, in_itemsize, out_itemsize):
    """Double-buffered VMEM footprint with (sublane, lane) padding accounted."""
    d_pad = _round_up(feat_dim, 128)
    x_buf = tb * d_pad * in_itemsize                  # (tb, D) tile
    w_buf = 16 * d_pad * in_itemsize                  # (1, D) padded row tile
    o_buf = 16 * _round_up(tb, 128) * out_itemsize    # (1, tb) padded row tile
    return 2 * (x_buf + w_buf + o_buf) + (4 << 20)    # 2 buffers each + headroom


def linear_forward(x, weight, bias, *, min_pallas_batch=1024):
    """xDeepFM Linear forward: (B, D) @ (1, D)^T + (1,) -> (B, 1)."""
    B, D = x.shape
    weight = weight.reshape(1, D)
    bias = bias.reshape(1)

    # bf16 activations use bf16 weights on the MXU with f32 accumulation
    # (slight deviation from a pure-f32 torch reference; fine at small D).
    w2 = weight.astype(x.dtype)
    b1 = bias.astype(jnp.float32)             # scalar, read from SMEM

    def _xla_path():
        return (x @ w2.T + bias.astype(x.dtype)).reshape(B, 1)

    if B < max(min_pallas_batch, 128):
        # Tiny problem: per-call / per-grid-step overhead dominates; let
        # plain XLA handle it.
        return _xla_path()

    in_itemsize = jnp.dtype(x.dtype).itemsize
    out_itemsize = in_itemsize
    vmem_cap = _vmem_capacity_bytes()
    # Per-generation x-buffer target: ~1/8 of VMEM -> 8 MiB on v7x (64 MiB),
    # 16 MiB on v5e/v6e (128 MiB); two buffers stay well under the limit.
    per_buffer = max(4 << 20, vmem_cap // 8)
    tb = _choose_batch_tile(B, D, in_itemsize, per_buffer)

    vmem_need = _vmem_need_bytes(tb, D, in_itemsize, out_itemsize)
    vmem_limit = int(0.72 * vmem_cap)   # ~46 MiB on v7x, ~92 MiB on v5e/v6e
    if vmem_need > vmem_limit:
        # TODO(synk): add a feature-dim (K) reduction grid axis for very large
        # D instead of bailing out; not needed for xDeepFM's small input_dim.
        return _xla_path()

    grid = pl.cdiv(B, tb)
    cost = pl.CostEstimate(
        flops=2 * B * D,
        transcendentals=0,
        bytes_accessed=B * D * in_itemsize + B * out_itemsize + D * in_itemsize,
    )

    out = pl.pallas_call(
        _linear_kernel,
        out_shape=jax.ShapeDtypeStruct((1, B), x.dtype),
        grid_spec=pltpu.PrefetchScalarGridSpec(
            num_scalar_prefetch=0,
            grid=(grid,),
            in_specs=[
                # x tile; ragged last block is allowed (no jnp.pad copy):
                # out-of-range rows only feed output lanes >= B, whose stores
                # Pallas masks out.
                pl.BlockSpec((tb, D), lambda i: (i, 0)),
                pl.BlockSpec((1, D), lambda i: (0, 0)),              # weight
                pl.BlockSpec(memory_space=pltpu.MemorySpace.SMEM),   # bias
            ],
            out_specs=pl.BlockSpec((1, tb), lambda i: (0, i)),       # lane-dense
        ),
        compiler_params=pltpu.CompilerParams(
            dimension_semantics=("parallel",),
            vmem_limit_bytes=vmem_limit,
        ),
        cost_estimate=cost,
    )(x, w2, b1)

    # (1, B) lane-dense result -> (B, 1), matching nn.Linear(input_dim, 1).
    return out.reshape(B, 1)


if __name__ == "__main__":
    key = jax.random.PRNGKey(0)
    kx, kw, kb, kx2, kx3 = jax.random.split(key, 5)

    input_dim = 32
    # Deterministic init (mimics nn.Linear's uniform(-1/sqrt(D), 1/sqrt(D))).
    bound = 1.0 / jnp.sqrt(jnp.float32(input_dim))
    weight = jax.random.uniform(kw, (1, input_dim), minval=-bound, maxval=bound,
                                dtype=jnp.float32)
    bias = jax.random.uniform(kb, (1,), minval=-bound, maxval=bound,
                              dtype=jnp.float32)

    # 1) Pallas path (force it for the test): even batch, 2 grid steps.
    batch = 256
    x = jax.random.normal(kx, (batch, input_dim), dtype=jnp.float32)
    out = jax.block_until_ready(linear_forward(x, weight, bias, min_pallas_batch=1))
    ref = x @ weight.T + bias
    assert out.shape == (batch, 1)
    assert jnp.allclose(out, ref, atol=1e-5, rtol=1e-5)

    # 2) Pallas path with a ragged batch (partial last block, no jnp.pad copy).
    batch_r = 300
    x_r = jax.random.normal(kx3, (batch_r, input_dim), dtype=jnp.float32)
    out_r = jax.block_until_ready(linear_forward(x_r, weight, bias, min_pallas_batch=1))
    ref_r = x_r @ weight.T + bias
    assert out_r.shape == (batch_r, 1)
    assert jnp.allclose(out_r, ref_r, atol=1e-5, rtol=1e-5)

    # 3) Tiny-shape fast path (dispatches to plain XLA per perf guidance).
    x_small = jax.random.normal(kx2, (8, input_dim), dtype=jnp.float32)
    out_small = jax.block_until_ready(linear_forward(x_small, weight, bias))
    ref_small = x_small @ weight.T + bias
    assert out_small.shape == (8, 1)
    assert jnp.allclose(out_small, ref_small, atol=1e-5, rtol=1e-5)

    print("KERNEL_OK")
</pallas_src>

<mosaic_0001>
module attributes {stable_mosaic.version = 11 : i64} {
  func.func @_linear_kernel(%arg0: i32, %arg1: memref<128x32xf32, #tpu.memory_space<vmem>>, %arg2: memref<1x32xf32, #tpu.memory_space<vmem>>, %arg3: memref<1xf32, #tpu.memory_space<smem>>, %arg4: memref<1x128xf32, #tpu.memory_space<vmem>>) attributes {dimension_semantics = [#tpu.dimension_semantics<parallel>], iteration_bounds = array<i64: 2>, scalar_prefetch = 0 : i64, scratch_operands = 0 : i64, tpu.core_type = #tpu.core_type<tc>, window_params = [{transform_indices = @transform_0, window_bounds = array<i64: 128, 32>}, {pipeline_mode = #tpu.pipeline_mode<synchronous>, transform_indices = @transform_1, window_bounds = array<i64: 1, 32>}, {transform_indices = @transform_2, window_bounds = array<i64: 1>}, {transform_indices = @transform_3, window_bounds = array<i64: 1, 128>}]} {
    %c0 = arith.constant 0 : index
    %c0_0 = arith.constant 0 : index
    %0 = vector.load %arg2[%c0, %c0_0] : memref<1x32xf32, #tpu.memory_space<vmem>>, vector<1x32xf32>
    %c0_1 = arith.constant 0 : index
    %c0_2 = arith.constant 0 : index
    %1 = vector.load %arg1[%c0_1, %c0_2] : memref<128x32xf32, #tpu.memory_space<vmem>>, vector<128x32xf32>
    %cst = arith.constant dense<0.000000e+00> : vector<1x128xf32>
    %2 = tpu.matmul %0, %1, %cst {dimension_numbers = #tpu.dot_dimension_numbers<[1], [1], [0], [0], [0, 0, 1, 0], [], []>} : vector<1x32xf32>, vector<128x32xf32>, vector<1x128xf32> -> vector<1x128xf32>
    %c0_3 = arith.constant 0 : index
    %3 = memref.load %arg3[%c0_3] : memref<1xf32, #tpu.memory_space<smem>>
    %4 = vector.broadcast %3 : f32 to vector<1x128xf32>
    %5 = arith.addf %2, %4 : vector<1x128xf32>
    %c0_4 = arith.constant 0 : index
    %c0_5 = arith.constant 0 : index
    %6 = vector.load %arg4[%c0_4, %c0_5] : memref<1x128xf32, #tpu.memory_space<vmem>>, vector<1x128xf32>
    tpu.vector_store %arg4[%c0_4, %c0_5], %5 {strides = array<i32>} : memref<1x128xf32, #tpu.memory_space<vmem>>, vector<1x128xf32>,
    return
  }
  func.func @transform_0(%arg0: i32) -> (i32, i32) {
    %c0_i32 = arith.constant 0 : i32
    %c0_i32_0 = arith.constant 0 : i32
    return %arg0, %c0_i32 : i32, i32
  }
  func.func @transform_1(%arg0: i32) -> (i32, i32) {
    %c0_i32 = arith.constant 0 : i32
    %c0_i32_0 = arith.constant 0 : i32
    %c0_i32_1 = arith.constant 0 : i32
    return %c0_i32, %c0_i32_0 : i32, i32
  }
  func.func @transform_2(%arg0: i32) -> i32 {
    %c0_i32 = arith.constant 0 : i32
    %c0_i32_0 = arith.constant 0 : i32
    return %c0_i32 : i32
  }
  func.func @transform_3(%arg0: i32) -> (i32, i32) {
    %c0_i32 = arith.constant 0 : i32
    %c0_i32_0 = arith.constant 0 : i32
    return %c0_i32, %arg0 : i32, i32
  }
}

</mosaic_0001>

<bundles_post_ra>
// kernel: tpu_custom_call.1
= control target key start
LH: loop header
LB: loop body
LE: loop exit
PB: predicated region body
PF: predicated region fallthrough
CT: control target
= control target key end

     0   :  { %s767_s0 = inlined_call_operand.vmem [shape: f32[256,32], index: 0, kind: input, shape index: {}]   ;;  %s768_s1 = inlined_call_operand.vmem [shape: f32[1,32], index: 1, kind: input, shape index: {}]   ;;  %s769_s2 = inlined_call_operand.<no memory space> [shape: f32[1], index: 2, kind: input, shape index: {}]   ;;  %s770_s3 = inlined_call_operand.hbm [shape: f32[1,256], index: 3, kind: output, shape index: {}]  }
   0x1   :  { %8 = sst [smem:[#allocation2]] %s769_s2 }
   0x2   :  { %9 = vsyncpa [#allocation4], 0 }
   0x3   :  { %11 = vsyncpa [#allocation4 + $0x1], 0  ;;  %s624_s14 = smov 0   ;;  %s626_s15 = smov 0  }
   0x4   :  { %s628_s16 = smov 0   ;;  %s630_s17 = smov 0  }
   0x5 LB: > { %s380_s2 = sadd.s32 4294967295, %s595_s17   ;;  %s381_s18 = sadd.s32 4294967294, %s595_s17   ;;  %s595_s17 = sphi %s630_s17, %s778_s17   ;;  %s591_s16 = sphi %s628_s16, %s777_s16   ;;  %s587_s15 = sphi %s626_s15, %s776_s15   ;;  %s583_s14 = sphi %s624_s14, %s775_s14  }
   0x6   : > { %s647_s19 = sadd.s32 1, %s595_s17   ;;  %s92_s20 = sadd.s32 1, %s591_s16 }
   0x7   : > { %s89_s21 = ssub.s32 %s595_s17, %s647_s19  ;;  %p102_p0 = scmp.ne.s32.totalorder %s591_s16, %s587_s15 }
   0x8   : > { %p90_p1 = scmp.eq.s32.totalorder %s89_s21, 0  ;;  %p103_p2 = scmp.eq.s32.totalorder %s380_s2, 1 }
   0x9   : > { %p108_p3 = scmp.ne.s32.totalorder %s587_s15, %s583_s14  ;;  %p109_p4 = scmp.eq.s32.totalorder %s381_s18, 1 }
   0xa   : > { %s657_s22 = scalar_select %p90_p1, %s591_s16, %s92_s20  }
   0xb   : > { %p659_p5 = por %p103_p2, %p102_p0  ;;  %p663_p6 = por %p109_p4, %p108_p3 }
   0xc   : > { %p384_p7 = scmp.ge.s32.totalorder %s595_s17, 1  ;;  %p142_p8 = scmp.lt.s32.totalorder %s595_s17, 3 }
   0xe   : > { %p143_p9 = pnand %p384_p7, %p142_p8 }
   0xf   : > { %s669_s25 = sshll.u32 (!%p143_p9), %s380_s2, 4  ;;  %v597_v0 = vmov (!%p143_p9), 0.0|0.0   ;;  %vm598_vm0 = vmmov (!%p143_p9), 0   ;;  %v599_v1 = vmov (!%p143_p9), 0.0   ;;  %vm190_vm1 = vcmask (!%p143_p9), 261120   ;;  %s188_s6 = sld [smem:[#allocation2]] (!%p143_p9) }
  0x10   : > { %146 = sbr.rel (%p143_p9) target bundleno = 321 (0x141), region = 32  ;;  %459 = vmatprep.subr.bf16.mxu0 (!%p143_p9), %v597_v0  ;;  %p166_p10 = scmp.lt.s32.totalorder (!%p143_p9), %s669_s25, 31  ;;  %456 = vmatprep.mubr.msk.f32.mxu0 (!%p143_p9), %vm598_vm0, %v599_v1  ;;  %vm682_vm2 = vmpackc.low (!%p143_p9), %vm190_vm1, %vm190_vm1  ;;  %v171_v27 = vld [vmem:[%s768_s1] sm:$0x1] (!%p143_p9) }
  0x11   : > { %s163_s7 = sand.u32 (!%p143_p9), 1, %s587_s15   ;;  %s725_s12 = scalar_lea.hbm (!%p143_p9), %s770_s3, %s669_s25 }
  0x12   : > { %s164_s8 = scalar_lea.vmem (!%p143_p9), [#allocation3], %s163_s7  ;;  %s314_s13 = scalar_lea.sflag (!%p143_p9), [#allocation4], %s163_s7 }
  0x13   : > { %s326_s9 = sshll.u32 (!%p143_p9), %s164_s8, 4  ;;  %s600_s18 = smov (!%p143_p9), [#allocation3]   ;;  %s727_s9 = int_to_ptr.vmem [resolvable:$true] %s326_s9 }
  0x14   : > { %s533_s2 = scalar_lea.vmem (!%p143_p9), %s727_s9, 16  ;;  %s537_s20 = sshll.u32 (!%p143_p9), %s600_s18, 4  ;;  %s538_s20 = int_to_ptr.vmem [resolvable:$false] %s537_s20 }
  0x15   : > { %v189_v28 = vstv (!%p143_p9), %s188_s6  ;;  %p534_p11 = scmp.ne.s32.totalorder (!%p143_p9), %s727_s9, %s533_s2  ;;  %s539_s21 = scalar_lea.vmem (!%p143_p9), %s538_s20, 32 }
  0x16   : > { %p540_p0 = scmp.lt.s32.totalorder (!%p143_p9), %s727_s9, %s538_s20  ;;  %p541_p1 = scmp.lt.s32.totalorder (!%p143_p9), %s539_s21, %s533_s2 }
  0x17   : > { %s167_s26 = scalar_select %p166_p10, %s669_s25, 31 }
  0x18   : > { %p535_p12 = pnand %p534_p11, %p659_p5  ;;  %p542_p2 = por %p541_p1, %p540_p0 }
  0x19   : > { %s386_s27 = sshll.u32 %s167_s26, 3 }
  0x1a   : > { %s676_s30 = scalar_lea.vmem %s767_s0, %s386_s27  ;;  %p536_p13 = pneg %p535_p12 }
  0x1b   : > { %v172_v2 = vld [vmem:[%s676_s30] sm:$0xff]  ;;  %v173_v3 = vld [vmem:[%s676_s30 + $0x8] sm:$0xff]  ;;  %v174_v6 = vld [vmem:[%s676_s30 + $0x10] sm:$0xff] }
  0x1c   : > { %v460_v5 = vpack.c.bf16 %v173_v3, %v172_v2  ;;  %v175_v7 = vld [vmem:[%s676_s30 + $0x18] sm:$0xff]  ;;  %v176_v9 = vld [vmem:[%s676_s30 + $0x20] sm:$0xff]  ;;  %v177_v10 = vld [vmem:[%s676_s30 + $0x28] sm:$0xff]  ;;  %p543_p3 = pnand %p542_p2, %p536_p13 }
  0x1d   : > { %v464_v8 = vpack.c.bf16 %v175_v7, %v174_v6  ;;  %v468_v11 = vpack.c.bf16 %v177_v10, %v176_v9  ;;  %v178_v12 = vld [vmem:[%s676_s30 + $0x30] sm:$0xff]  ;;  %v179_v13 = vld [vmem:[%s676_s30 + $0x38] sm:$0xff]  ;;  %v180_v15 = vld [vmem:[%s676_s30 + $0x40] sm:$0xff] }
  0x1e   : > { %462 = vmatpush3.bf16.xpose.msk.msra.mxu0 %vm682_vm2, %v460_v5  ;;  %v472_v14 = vpack.c.bf16 %v179_v13, %v178_v12  ;;  %v181_v16 = vld [vmem:[%s676_s30 + $0x48] sm:$0xff]  ;;  %v182_v18 = vld [vmem:[%s676_s30 + $0x50] sm:$0xff]  ;;  %v183_v19 = vld [vmem:[%s676_s30 + $0x58] sm:$0xff] }
  0x1f   : > { %463 = vmatprep.subr.bf16.mxu0 %v597_v0  ;;  %v476_v17 = vpack.c.bf16 %v181_v16, %v180_v15  ;;  %v480_v20 = vpack.c.bf16 %v183_v19, %v182_v18  ;;  %v184_v21 = vld [vmem:[%s676_s30 + $0x60] sm:$0xff]  ;;  %v185_v22 = vld [vmem:[%s676_s30 + $0x68] sm:$0xff]  ;;  %v186_v24 = vld [vmem:[%s676_s30 + $0x70] sm:$0xff] }
  0x20   : > { %v484_v23 = vpack.c.bf16 %v185_v22, %v184_v21  ;;  %v187_v25 = vld [vmem:[%s676_s30 + $0x78] sm:$0xff] }
  0x21   : > { %v488_v26 = vpack.c.bf16 %v187_v25, %v186_v24 }
  0x26   : > { %466 = vmatpush3.bf16.xpose.msk.msra.mxu0 %vm682_vm2, %v464_v8 }
  0x27   : > { %467 = vmatprep.subr.bf16.mxu0 %v597_v0 }
  0x2e   : > { %470 = vmatpush3.bf16.xpose.msk.msra.mxu0 %vm682_vm2, %v468_v11 }
  0x2f   : > { %471 = vmatprep.subr.bf16.mxu0 %v597_v0 }
  0x36   : > { %474 = vmatpush3.bf16.xpose.msk.msra.mxu0 %vm682_vm2, %v472_v14 }
  0x37   : > { %475 = vmatprep.subr.bf16.mxu0 %v597_v0 }
  0x3e   : > { %478 = vmatpush3.bf16.xpose.msk.msra.mxu0 %vm682_vm2, %v476_v17 }
  0x3f   : > { %479 = vmatprep.subr.bf16.mxu0 %v597_v0 }
  0x46   : > { %482 = vmatpush3.bf16.xpose.msk.msra.mxu0 %vm682_vm2, %v480_v20 }
  0x47   : > { %483 = vmatprep.subr.bf16.mxu0 %v597_v0 }
  0x4e   : > { %486 = vmatpush3.bf16.xpose.msk.msra.mxu0 %vm682_vm2, %v484_v23 }
  0x4f   : > { %487 = vmatprep.subr.bf16.mxu0 %v597_v0 }
  0x56   : > { %490 = vmatpush3.bf16.xpose.msk.msra.mxu0 %vm682_vm2, %v488_v26 }
  0x5d   : > { %457 = vmatmul.mubr.msk.f32.vlgmr.msra.gmra.mrb[0].mxu0 %vm190_vm1, %v171_v27 }
 0x130   : > { %v308_v29 = vpop.f32.mrb[0].mxu0 }
 0x131   : > { %v309_v30 = vadd.f32 %v308_v29, %v189_v28  ;;  %v458_v31 = vpop.f32.mrb[1].mxu0 }
 0x133   : > { %312 = vst [vmem:[%s164_s8] sm:$0x1] %v309_v30 }
 0x134   : > { %546 = shalt.err (!%p543_p3)
}
 0x135   : > { %s547_s25 = scalar_lea.hbm %s725_s12, 16  ;;  %s551_s28 = scalar_lea.hbm %s770_s3, 32 }
 0x136   : > { %p548_p4 = scmp.ne.s32.totalorder %s725_s12, %s547_s25  ;;  %p552_p9 = scmp.lt.u32.totalorder %s725_s12, %s770_s3 }
 0x137   : > { %p553_p10 = scmp.lt.u32.totalorder %s551_s28, %s547_s25  ;;  %p555_p12 = scmp.lt.u32.totalorder %s547_s25, %s725_s12 }
 0x138   : > { %p549_p7 = pnand %p548_p4, %p659_p5 }
 0x139   : > { %p554_p11 = por %p553_p10, %p552_p9 }
 0x13a   : > { %p550_p8 = pneg %p549_p7 }
 0x13b   : > { %p556_p13 = por %p555_p12, %p554_p11 }
 0x13d   : > { %p557_p0 = pnand %p556_p13, %p550_p8 }
 0x13f   : > { %560 = shalt.err (!%p557_p0)
}
 0x140   : > { %491 = dma.vmem_to_hbm [thread:$0]  (%p659_p5), %s727_s9, 16, %s725_s12, %s314_s13  }
 0x141 PF: > { %p497_p1 = scmp.ge.s32.totalorder %s595_s17, 2  ;;  %s338_s4 = sand.u32 1, %s583_s14  }
 0x142   : > { %s339_s5 = scalar_lea.sflag [#allocation4], %s338_s4 }
 0x143   : > { %p494_p2 = pnand %p497_p1, %p663_p6 }
 0x145   : > { %578 = dma.done.wait (!%p494_p2), %s339_s5, 16  }
 0x146   : > { %580 = vsyncadd (!%p494_p2), %s339_s5, 4294967280  ;;  %p14_p3 = scmp.ge.s32.totalorder %s647_s19, 4   ;;  %s775_s14 = smov %s587_s15 }
 0x147   : > { %s776_s15 = smov %s591_s16  ;;  %s777_s16 = smov %s657_s22 }
 0x148   : > { %s778_s17 = smov %s647_s19  ;;  %16 = sbr.rel (!%p14_p3) target bundleno = 5 (0x5), region = 67 }
 0x14f   :  { %343 = vsyncpa [#allocation4], 1 }
 0x150   :  { %345 = vsyncpa [#allocation4 + $0x1], 1 }

</bundles_post_ra>
